<compile_context>
chip_gen: v5e
topology: v5e:2x2
jax: 0.10.0
libtpu: 0.0.40
codegen_flags: <defaults>
</compile_context>

<pallas_src>
import functools

import jax
import jax.numpy as jnp
from jax.experimental import pallas as pl
from jax.experimental.pallas import tpu as pltpu

_SUBLANE = 8


def _round_up(n, m):
    return ((n + m - 1) // m) * m


def _mlp_kernel(x_ref, w1_ref, b1_ref, w2_ref, b2_ref,
                w3_ref, b3_ref, w4_ref, b4_ref, o_ref):
    # One tb-row batch tile; all four matmuls + ReLUs fused so intermediates
    # never leave VMEM. Weights are bf16, accumulate/bias/ReLU in f32.
    x = x_ref[...].astype(jnp.bfloat16)
    h = jnp.dot(x, w1_ref[...], preferred_element_type=jnp.float32) + b1_ref[...]
    h = jnp.maximum(h, 0.0)
    # Dropout(p=0.3) is identity at inference.
    h = jnp.dot(h.astype(jnp.bfloat16), w2_ref[...],
                preferred_element_type=jnp.float32) + b2_ref[...]
    h = jnp.maximum(h, 0.0)
    h = jnp.dot(h.astype(jnp.bfloat16), w3_ref[...],
                preferred_element_type=jnp.float32) + b3_ref[...]
    h = jnp.maximum(h, 0.0)
    out = jnp.dot(h.astype(jnp.bfloat16), w4_ref[...],
                  preferred_element_type=jnp.float32) + b4_ref[...]
    o_ref[...] = out.astype(o_ref.dtype)


def init_params(key, input_size, num_classes):
    """PyTorch-style uniform init. Weights are stored (in_features, out_features),
    i.e. transposed vs torch.nn.Linear.weight, so the kernel computes x @ W + b."""
    dims = [(input_size, 128), (128, 64), (64, 32), (32, num_classes)]
    params = {}
    keys = jax.random.split(key, 2 * len(dims))
    for i, (fan_in, fan_out) in enumerate(dims):
        bound = 1.0 / float(fan_in) ** 0.5
        w = jax.random.uniform(keys[2 * i], (fan_in, fan_out),
                               dtype=jnp.float32, minval=-bound, maxval=bound)
        b = jax.random.uniform(keys[2 * i + 1], (1, fan_out),
                               dtype=jnp.float32, minval=-bound, maxval=bound)
        params[f"w{i + 1}"] = w
        params[f"b{i + 1}"] = b
    return params


def pack_params(params):
    """One-time packing: cast weights to bf16 (halves weight DMA/VMEM, fast MXU
    rate); biases stay f32 with shape (1, out_features). No feature-dim padding —
    every BlockSpec below uses the full (unpadded) array dims, which is legal and
    keeps HBM traffic at the logical width."""
    packed = {}
    for i in range(1, 5):
        packed[f"w{i}"] = jnp.asarray(params[f"w{i}"], jnp.float32).astype(jnp.bfloat16)
        packed[f"b{i}"] = jnp.asarray(params[f"b{i}"], jnp.float32).reshape(1, -1)
    return packed


@functools.partial(jax.jit, static_argnames=("block_b",))
def voice_classifier_forward(x, packed, *, block_b=2048):
    """x: (B, input_size) f32. packed: output of pack_params().
    Returns (B, num_classes) f32."""
    B, in_features = x.shape
    assert packed["w1"].shape[0] == in_features
    num_classes = packed["w4"].shape[1]

    # Batch tile: multiple of 8 sublanes, capped at block_b rows. If the whole
    # batch would fit in a single tile but is big enough to split, use 2 tiles
    # so both v7x TensorCores get work (no-op cost on 1-TC v5e/v6e).
    b8 = _round_up(B, _SUBLANE)
    tb = min(block_b, b8)
    if tb == b8 and b8 >= 2 * _SUBLANE:
        tb = _round_up((b8 + 1) // 2, _SUBLANE)
    b_pad = _round_up(B, tb)

    x_p = x if b_pad == B else jnp.pad(x, ((0, b_pad - B), (0, 0)))

    grid = (b_pad // tb,)
    const2d = lambda i: (0, 0)  # weights/biases: same whole-array block every step

    in_specs = [pl.BlockSpec((tb, in_features), lambda i: (i, 0))]
    operands = [x_p]
    for li in range(1, 5):
        w, b = packed[f"w{li}"], packed[f"b{li}"]
        in_specs += [pl.BlockSpec(w.shape, const2d),
                     pl.BlockSpec(b.shape, const2d)]
        operands += [w, b]

    flops = 2 * b_pad * sum(
        packed[f"w{i}"].shape[0] * packed[f"w{i}"].shape[1] for i in range(1, 5))
    bytes_accessed = (
        b_pad * in_features * 4                                   # x (f32)
        + sum(packed[f"w{i}"].size * 2 + packed[f"b{i}"].size * 4
              for i in range(1, 5))                               # w bf16, b f32
        + b_pad * num_classes * 4)                                # output (f32)

    out = pl.pallas_call(
        _mlp_kernel,
        out_shape=jax.ShapeDtypeStruct((b_pad, num_classes), jnp.float32),
        grid=grid,
        in_specs=in_specs,
        out_specs=pl.BlockSpec((tb, num_classes), lambda i: (i, 0)),
        compiler_params=pltpu.CompilerParams(
            dimension_semantics=("parallel",)),
        cost_estimate=pl.CostEstimate(
            flops=flops, transcendentals=0, bytes_accessed=bytes_accessed),
    )(*operands)

    return out if b_pad == B else out[:B]


if __name__ == "__main__":
    key = jax.random.PRNGKey(0)
    k_param, k_x1, k_x2 = jax.random.split(key, 3)

    input_size = 40      # e.g. 40 MFCC features per utterance
    num_classes = 8

    params = init_params(k_param, input_size, num_classes)
    packed = pack_params(params)

    def reference_forward(x):
        # Pure-JAX mirror of the kernel math (bf16 matmul inputs, f32 accumulate).
        def mm(a, w):
            return jnp.dot(a.astype(jnp.bfloat16), w.astype(jnp.bfloat16),
                           preferred_element_type=jnp.float32)
        h = jnp.maximum(mm(x, params["w1"]) + params["b1"], 0.0)
        h = jnp.maximum(mm(h, params["w2"]) + params["b2"], 0.0)
        h = jnp.maximum(mm(h, params["w3"]) + params["b3"], 0.0)
        return mm(h, params["w4"]) + params["b4"]

    # Small-shape smoke test (B=8): single 8-row tile, grid of 1.
    x_small = jax.random.normal(k_x1, (8, input_size), dtype=jnp.float32)
    out_small = jax.block_until_ready(voice_classifier_forward(x_small, packed))
    assert out_small.shape == (8, num_classes)
    assert jnp.allclose(out_small, reference_forward(x_small),
                        atol=1e-3, rtol=1e-3), "mismatch vs reference (B=8)"

    # B=200 with default tile: batch padded 200 -> 208, split into 2 tiles of
    # 104 rows (both v7x TensorCores active), sliced back to 200.
    x_big = jax.random.normal(k_x2, (200, input_size), dtype=jnp.float32)
    out_big = jax.block_until_ready(voice_classifier_forward(x_big, packed))
    assert out_big.shape == (200, num_classes)
    assert jnp.allclose(out_big, reference_forward(x_big),
                        atol=1e-3, rtol=1e-3), "mismatch vs reference (B=200)"

    # Exercise deeper batch tiling: 64-row tiles -> batch padded to 256, grid of 4.
    out_tiled = jax.block_until_ready(
        voice_classifier_forward(x_big, packed, block_b=64))
    assert out_tiled.shape == (200, num_classes)
    assert jnp.allclose(out_tiled, reference_forward(x_big),
                        atol=1e-3, rtol=1e-3), "mismatch vs reference (tiled)"

    print("KERNEL_OK")
</pallas_src>

<mosaic_0001>
module attributes {stable_mosaic.version = 11 : i64} {
  func.func @_mlp_kernel(%arg0: i32, %arg1: memref<8x40xf32, #tpu.memory_space<vmem>>, %arg2: memref<40x128xbf16, #tpu.memory_space<vmem>>, %arg3: memref<1x128xf32, #tpu.memory_space<vmem>>, %arg4: memref<128x64xbf16, #tpu.memory_space<vmem>>, %arg5: memref<1x64xf32, #tpu.memory_space<vmem>>, %arg6: memref<64x32xbf16, #tpu.memory_space<vmem>>, %arg7: memref<1x32xf32, #tpu.memory_space<vmem>>, %arg8: memref<32x8xbf16, #tpu.memory_space<vmem>>, %arg9: memref<1x8xf32, #tpu.memory_space<vmem>>, %arg10: memref<8x8xf32, #tpu.memory_space<vmem>>) attributes {dimension_semantics = [#tpu.dimension_semantics<parallel>], iteration_bounds = array<i64: 1>, scalar_prefetch = 0 : i64, scratch_operands = 0 : i64, tpu.core_type = #tpu.core_type<tc>, window_params = [{transform_indices = @transform_0, window_bounds = array<i64: 8, 40>}, {pipeline_mode = #tpu.pipeline_mode<synchronous>, transform_indices = @transform_1, window_bounds = array<i64: 40, 128>}, {pipeline_mode = #tpu.pipeline_mode<synchronous>, transform_indices = @transform_2, window_bounds = array<i64: 1, 128>}, {pipeline_mode = #tpu.pipeline_mode<synchronous>, transform_indices = @transform_3, window_bounds = array<i64: 128, 64>}, {pipeline_mode = #tpu.pipeline_mode<synchronous>, transform_indices = @transform_4, window_bounds = array<i64: 1, 64>}, {pipeline_mode = #tpu.pipeline_mode<synchronous>, transform_indices = @transform_5, window_bounds = array<i64: 64, 32>}, {pipeline_mode = #tpu.pipeline_mode<synchronous>, transform_indices = @transform_6, window_bounds = array<i64: 1, 32>}, {pipeline_mode = #tpu.pipeline_mode<synchronous>, transform_indices = @transform_7, window_bounds = array<i64: 32, 8>}, {pipeline_mode = #tpu.pipeline_mode<synchronous>, transform_indices = @transform_8, window_bounds = array<i64: 1, 8>}, {transform_indices = @transform_9, window_bounds = array<i64: 8, 8>}]} {
    %c0 = arith.constant 0 : index
    %c0_0 = arith.constant 0 : index
    %0 = vector.load %arg1[%c0, %c0_0] : memref<8x40xf32, #tpu.memory_space<vmem>>, vector<8x40xf32>
    %1 = arith.truncf %0 : vector<8x40xf32> to vector<8x40xbf16>
    %c0_1 = arith.constant 0 : index
    %c0_2 = arith.constant 0 : index
    %2 = vector.load %arg2[%c0_1, %c0_2] : memref<40x128xbf16, #tpu.memory_space<vmem>>, vector<40x128xbf16>
    %cst = arith.constant dense<0.000000e+00> : vector<8x128xf32>
    %3 = tpu.matmul %1, %2, %cst {dimension_numbers = #tpu.dot_dimension_numbers<[1], [0], [0], [1], [0, 0, 1, 1], [], []>} : vector<8x40xbf16>, vector<40x128xbf16>, vector<8x128xf32> -> vector<8x128xf32>
    %c0_3 = arith.constant 0 : index
    %c0_4 = arith.constant 0 : index
    %4 = vector.load %arg3[%c0_3, %c0_4] : memref<1x128xf32, #tpu.memory_space<vmem>>, vector<1x128xf32>
    %5 = vector.broadcast %4 : vector<1x128xf32> to vector<8x128xf32>
    %6 = arith.addf %3, %5 : vector<8x128xf32>
    %cst_5 = arith.constant 0.000000e+00 : f32
    %7 = vector.broadcast %cst_5 : f32 to vector<8x128xf32>
    %8 = arith.maximumf %6, %7 : vector<8x128xf32>
    %9 = arith.truncf %8 : vector<8x128xf32> to vector<8x128xbf16>
    %c0_6 = arith.constant 0 : index
    %c0_7 = arith.constant 0 : index
    %10 = vector.load %arg4[%c0_6, %c0_7] : memref<128x64xbf16, #tpu.memory_space<vmem>>, vector<128x64xbf16>
    %cst_8 = arith.constant dense<0.000000e+00> : vector<8x64xf32>
    %11 = tpu.matmul %9, %10, %cst_8 {dimension_numbers = #tpu.dot_dimension_numbers<[1], [0], [0], [1], [0, 0, 1, 1], [], []>} : vector<8x128xbf16>, vector<128x64xbf16>, vector<8x64xf32> -> vector<8x64xf32>
    %c0_9 = arith.constant 0 : index
    %c0_10 = arith.constant 0 : index
    %12 = vector.load %arg5[%c0_9, %c0_10] : memref<1x64xf32, #tpu.memory_space<vmem>>, vector<1x64xf32>
    %13 = vector.broadcast %12 : vector<1x64xf32> to vector<8x64xf32>
    %14 = arith.addf %11, %13 : vector<8x64xf32>
    %cst_11 = arith.constant 0.000000e+00 : f32
    %15 = vector.broadcast %cst_11 : f32 to vector<8x64xf32>
    %16 = arith.maximumf %14, %15 : vector<8x64xf32>
    %17 = arith.truncf %16 : vector<8x64xf32> to vector<8x64xbf16>
    %c0_12 = arith.constant 0 : index
    %c0_13 = arith.constant 0 : index
    %18 = vector.load %arg6[%c0_12, %c0_13] : memref<64x32xbf16, #tpu.memory_space<vmem>>, vector<64x32xbf16>
    %cst_14 = arith.constant dense<0.000000e+00> : vector<8x32xf32>
    %19 = tpu.matmul %17, %18, %cst_14 {dimension_numbers = #tpu.dot_dimension_numbers<[1], [0], [0], [1], [0, 0, 1, 1], [], []>} : vector<8x64xbf16>, vector<64x32xbf16>, vector<8x32xf32> -> vector<8x32xf32>
    %c0_15 = arith.constant 0 : index
    %c0_16 = arith.constant 0 : index
    %20 = vector.load %arg7[%c0_15, %c0_16] : memref<1x32xf32, #tpu.memory_space<vmem>>, vector<1x32xf32>
    %21 = vector.broadcast %20 : vector<1x32xf32> to vector<8x32xf32>
    %22 = arith.addf %19, %21 : vector<8x32xf32>
    %cst_17 = arith.constant 0.000000e+00 : f32
    %23 = vector.broadcast %cst_17 : f32 to vector<8x32xf32>
    %24 = arith.maximumf %22, %23 : vector<8x32xf32>
    %25 = arith.truncf %24 : vector<8x32xf32> to vector<8x32xbf16>
    %c0_18 = arith.constant 0 : index
    %c0_19 = arith.constant 0 : index
    %26 = vector.load %arg8[%c0_18, %c0_19] : memref<32x8xbf16, #tpu.memory_space<vmem>>, vector<32x8xbf16>
    %cst_20 = arith.constant dense<0.000000e+00> : vector<8x8xf32>
    %27 = tpu.matmul %25, %26, %cst_20 {dimension_numbers = #tpu.dot_dimension_numbers<[1], [0], [0], [1], [0, 0, 1, 1], [], []>} : vector<8x32xbf16>, vector<32x8xbf16>, vector<8x8xf32> -> vector<8x8xf32>
    %c0_21 = arith.constant 0 : index
    %c0_22 = arith.constant 0 : index
    %28 = vector.load %arg9[%c0_21, %c0_22] : memref<1x8xf32, #tpu.memory_space<vmem>>, vector<1x8xf32>
    %29 = vector.broadcast %28 : vector<1x8xf32> to vector<8x8xf32>
    %30 = arith.addf %27, %29 : vector<8x8xf32>
    %c0_23 = arith.constant 0 : index
    %c0_24 = arith.constant 0 : index
    %31 = vector.load %arg10[%c0_23, %c0_24] : memref<8x8xf32, #tpu.memory_space<vmem>>, vector<8x8xf32>
    tpu.vector_store %arg10[%c0_23, %c0_24], %30 {strides = array<i32>} : memref<8x8xf32, #tpu.memory_space<vmem>>, vector<8x8xf32>,
    return
  }
  func.func @transform_0(%arg0: i32) -> (i32, i32) {
    %c0_i32 = arith.constant 0 : i32
    %c0_i32_0 = arith.constant 0 : i32
    return %arg0, %c0_i32 : i32, i32
  }
  func.func @transform_1(%arg0: i32) -> (i32, i32) {
    %c0_i32 = arith.constant 0 : i32
    %c0_i32_0 = arith.constant 0 : i32
    %c0_i32_1 = arith.constant 0 : i32
    return %c0_i32, %c0_i32_0 : i32, i32
  }
  func.func @transform_2(%arg0: i32) -> (i32, i32) {
    %c0_i32 = arith.constant 0 : i32
    %c0_i32_0 = arith.constant 0 : i32
    %c0_i32_1 = arith.constant 0 : i32
    return %c0_i32, %c0_i32_0 : i32, i32
  }
  func.func @transform_3(%arg0: i32) -> (i32, i32) {
    %c0_i32 = arith.constant 0 : i32
    %c0_i32_0 = arith.constant 0 : i32
    %c0_i32_1 = arith.constant 0 : i32
    return %c0_i32, %c0_i32_0 : i32, i32
  }
  func.func @transform_4(%arg0: i32) -> (i32, i32) {
    %c0_i32 = arith.constant 0 : i32
    %c0_i32_0 = arith.constant 0 : i32
    %c0_i32_1 = arith.constant 0 : i32
    return %c0_i32, %c0_i32_0 : i32, i32
  }
  func.func @transform_5(%arg0: i32) -> (i32, i32) {
    %c0_i32 = arith.constant 0 : i32
    %c0_i32_0 = arith.constant 0 : i32
    %c0_i32_1 = arith.constant 0 : i32
    return %c0_i32, %c0_i32_0 : i32, i32
  }
  func.func @transform_6(%arg0: i32) -> (i32, i32) {
    %c0_i32 = arith.constant 0 : i32
    %c0_i32_0 = arith.constant 0 : i32
    %c0_i32_1 = arith.constant 0 : i32
    return %c0_i32, %c0_i32_0 : i32, i32
  }
  func.func @transform_7(%arg0: i32) -> (i32, i32) {
    %c0_i32 = arith.constant 0 : i32
    %c0_i32_0 = arith.constant 0 : i32
    %c0_i32_1 = arith.constant 0 : i32
    return %c0_i32, %c0_i32_0 : i32, i32
  }
  func.func @transform_8(%arg0: i32) -> (i32, i32) {
    %c0_i32 = arith.constant 0 : i32
    %c0_i32_0 = arith.constant 0 : i32
    %c0_i32_1 = arith.constant 0 : i32
    return %c0_i32, %c0_i32_0 : i32, i32
  }
  func.func @transform_9(%arg0: i32) -> (i32, i32) {
    %c0_i32 = arith.constant 0 : i32
    %c0_i32_0 = arith.constant 0 : i32
    return %arg0, %c0_i32 : i32, i32
  }
}

</mosaic_0001>

<bundles_post_ra>
// kernel: voice_classifier_forward.1
= control target key start
LH: loop header
LB: loop body
LE: loop exit
PB: predicated region body
PF: predicated region fallthrough
CT: control target
= control target key end

     0   :  { %vm64_vm0 = vcmask 1043456   ;;  %s510_s0 = inlined_call_operand.vmem [shape: f32[8,40], index: 0, kind: input, shape index: {}]   ;;  %s511_s1 = inlined_call_operand.vmem [shape: bf16[40,128], index: 1, kind: input, shape index: {}]   ;;  %s512_s2 = inlined_call_operand.vmem [shape: f32[1,128], index: 2, kind: input, shape index: {}]   ;;  %s513_s3 = inlined_call_operand.vmem [shape: bf16[128,64], index: 3, kind: input, shape index: {}]   ;;  %s514_s4 = inlined_call_operand.vmem [shape: f32[1,64], index: 4, kind: input, shape index: {}]   ;;  %s515_s5 = inlined_call_operand.vmem [shape: bf16[64,32], index: 5, kind: input, shape index: {}]   ;;  %s516_s6 = inlined_call_operand.vmem [shape: f32[1,32], index: 6, kind: input, shape index: {}]   ;;  %s517_s7 = inlined_call_operand.vmem [shape: bf16[32,8], index: 7, kind: input, shape index: {}]   ;;  %s518_s8 = inlined_call_operand.vmem [shape: f32[1,8], index: 8, kind: input, shape index: {}]   ;;  %s519_s9 = inlined_call_operand.hbm [shape: f32[8,8], index: 9, kind: output, shape index: {}]  }
   0x1   :  { %v40_v0 = vld [vmem:[%s511_s1 + $0x10] sm:$0xf]  ;;  %v352_v2 = vld [vmem:[%s513_s3 + $0x38] sm:$0xff] }
   0x2   :  { %v54_v1 = vunpack.c.l.b16 %v40_v0  ;;  %151 = vmatpush.bf16.msra.mxu1 %v352_v2  ;;  %v351_v4 = vld [vmem:[%s513_s3 + $0x30] sm:$0xff] }
   0x4   :  { %v57_v3 = vpack.c.b16 %v54_v1, %v54_v1 }
   0x6   :  { %v66_v5 = vsel %vm64_vm0, %v57_v3, 0 }
   0x7   :  { %14 = vsyncpa [#allocation3], 0  ;;  %73 = vmatpush.bf16.msra.mxu0 %v66_v5  ;;  %v344_v6 = vld [vmem:[%s511_s1 + $0x8] sm:$0xff]  ;;  %152 = vmatpush.bf16.msra.mxu1 %v351_v4  ;;  %v343_v8 = vld [vmem:[%s511_s1] sm:$0xff]  ;;  %vm60_vm1 = vcmask 326656   ;;  %vm202_vm2 = vcmask 523264  }
   0x8   :  { %v350_v7 = vld [vmem:[%s513_s3 + $0x28] sm:$0xff]  ;;  %v34_v9 = vld [vmem:[%s510_s0] sm:$0xff]  ;;  %v348_v12 = vld [vmem:[%s513_s3 + $0x18] sm:$0xff]  ;;  %vm241_vm3 = vcmask 261120   ;;  %s390_s26 = smov [#allocation2]   ;;  %s267_s0 = sshll.u32 %s519_s9, 4  ;;  %s268_s0 = int_to_ptr.hbm [resolvable:$true] %s267_s0 }
   0x9   :  { %v349_v10 = vld [vmem:[%s513_s3 + $0x20] sm:$0xff]  ;;  %v35_v11 = vpack.c.bf16 %v34_v9, %v34_v9  ;;  %v347_v13 = vld [vmem:[%s513_s3 + $0x10] sm:$0xff]  ;;  %v346_v14 = vld [vmem:[%s513_s3 + $0x8] sm:$0xff]  ;;  %s265_s1 = sshll.u32 %s390_s26, 4  ;;  %vm258_vm4 = vcmask 64512   ;;  %s266_s1 = int_to_ptr.vmem [resolvable:$true] %s265_s1 }
   0xa   :  { %v345_v15 = vld [vmem:[%s513_s3] sm:$0xff]  ;;  %v356_v16 = vld [vmem:[%s515_s5 + $0x18] sm:$0xff]  ;;  %v355_v17 = vld [vmem:[%s515_s5 + $0x10] sm:$0xff] }
   0xb   :  { %74 = vmatpush.bf16.msra.mxu0 %v344_v6  ;;  %153 = vmatpush.bf16.msra.mxu1 %v350_v7  ;;  %v360_v18 = vld [vmem:[%s512_s2] ss:$0 sm:$0xff]  ;;  %v354_v24 = vld [vmem:[%s515_s5 + $0x8] sm:$0xff] }
   0xc   :  { %210 = vmatpush.bf16.msra.mxu2 %v356_v16  ;;  %v353_v25 = vld [vmem:[%s515_s5] sm:$0xff]  ;;  %v358_v32 = vld [vmem:[%s517_s7 + $0x8] sm:$0xff] }
   0xd   :  { %v361_v26 = vld [vmem:[%s514_s4] ss:$0 sm:$0xff]  ;;  %251 = vmatpush.bf16.msra.mxu3 %v358_v32 }
   0xe   :  { %v357_v33 = vld [vmem:[%s517_s7] sm:$0xff] }
   0xf   :  { %75 = vmatpush.bf16.msra.mxu0 %v343_v8  ;;  %154 = vmatpush.bf16.msra.mxu1 %v349_v10  ;;  %v362_v34 = vld [vmem:[%s516_s6] ss:$0 sm:$0xff] }
  0x10   :  { %211 = vmatpush.bf16.msra.mxu2 %v355_v17  ;;  %v363_v40 = vld [vmem:[%s518_s8] ss:$0 sm:$0xff] }
  0x11   :  { %252 = vmatpush.bf16.msra.mxu3 %v357_v33 }
  0x12   :  { %284 = vmatmul.msk.bf16.vlgmr.msra.gmra.mxu0 %vm60_vm1, %v35_v11 }
  0x13   :  { %155 = vmatpush.bf16.msra.mxu1 %v348_v12 }
  0x14   :  { %212 = vmatpush.bf16.msra.mxu2 %v354_v24 }
  0x17   :  { %156 = vmatpush.bf16.msra.mxu1 %v347_v13 }
  0x18   :  { %213 = vmatpush.bf16.msra.mxu2 %v353_v25 }
  0x1b   :  { %157 = vmatpush.bf16.msra.mxu1 %v346_v14 }
  0x1f   :  { %158 = vmatpush.bf16.msra.mxu1 %v345_v15 }
  0x8f   :  { %v77_v19 = vpop.f32.mrf.mxu0 }
  0x90   :  { %v78_v20 = vadd.f32 %v360_v18, %v77_v19 }
  0x92   :  { %v81_v21 = vmax.f32 %v78_v20, 0.0 }
  0x94   :  { %v82_v22 = vpack.c.bf16 %v81_v21, %v81_v21 }
  0x96   :  { %159 = vmatmul.bf16.vlgmr.msra.gmra.mxu1 %v82_v22 }
  0x97   :  { %v79_v23 = vpop.f32.mrf.mxu0 }
 0x113   :  { %v160_v27 = vpop.f32.mrf.mxu1 }
 0x114   :  { %v161_v28 = vadd.f32 %v361_v26, %v160_v27 }
 0x116   :  { %v164_v29 = vmax.f32 %v161_v28, 0.0 }
 0x118   :  { %v165_v30 = vpack.c.bf16 %v164_v29, %v164_v29 }
 0x11a   :  { %333 = vmatmul.msk.bf16.vlgmr.msra.gmra.mxu2 %vm202_vm2, %v165_v30 }
 0x11b   :  { %v162_v31 = vpop.f32.mrf.mxu1 }
 0x19d   :  { %v215_v35 = vpop.f32.mrf.mxu2 }
 0x19e   :  { %v216_v36 = vadd.f32 %v362_v34, %v215_v35 }
 0x1a0   :  { %v219_v37 = vmax.f32 %v216_v36, 0.0 }
 0x1a2   :  { %v220_v38 = vpack.c.bf16 %v219_v37, %v219_v37 }
 0x1a4   :  { %342 = vmatmul.msk.bf16.vlgmr.msra.gmra.mxu3 %vm241_vm3, %v220_v38 }
 0x1a5   :  { %v217_v39 = vpop.f32.mrf.mxu2 }
 0x227   :  { %v254_v41 = vpop.f32.mrf.mxu3 }
 0x228   :  { %v255_v42 = vadd.f32 %v363_v40, %v254_v41 }
 0x22a   :  { %259 = vst.msk [vmem:[#allocation2] sm:$0xff] %vm258_vm4, %v255_v42 }
 0x22b   :  { %270 = dma.vmem_to_hbm [thread:$0]  %s266_s1, 128, %s268_s0, [#allocation3]  }
 0x22f   :  { %v256_v43 = vpop.f32.mrf.mxu3 }
 0x230   :  { %388 = dma.done.wait [#allocation3], 128  }
 0x231   :  { %389 = vsyncadd [#allocation3], 4294967168 }
 0x232   :  { %275 = vsyncpa [#allocation3], 1 }

</bundles_post_ra>
